<compile_context>
chip_gen: v7x
topology: tpu7x:2x2x1
jax: 0.10.0
libtpu: 0.0.40
codegen_flags: <defaults>
</compile_context>

<pallas_src>
import jax
import jax.numpy as jnp
from jax.experimental import pallas as pl
from jax.experimental.pallas import tpu as pltpu


def _downsample4_kernel(w_ref, x_ref, o_ref):
    # w_ref: (Cout, K)  -- 0.25 pre-folded weight, resident across grid steps
    # x_ref: (K, TM)    -- 4*Cin packed bilinear taps, lane-dense on M
    # o_ref: (Cout, TM) -- lane-dense output tile
    o_ref[...] = jnp.dot(
        w_ref[...], x_ref[...], preferred_element_type=jnp.float32
    ).astype(o_ref.dtype)


def downsample_4(x, weight, *, block_m=16384):
    """x: (N, Cin, H, W) f32 NCHW; weight: (Cout, Cin, 1, 1). Returns (N, Cout, H//4, W//4)."""
    N, Cin, H, W = x.shape
    Cout = weight.shape[0]
    assert H >= 4 and W >= 4, "spatial dims must be >= 4"
    Ho, Wo = H // 4, W // 4
    M = N * Ho * Wo
    K = 4 * Cin

    # --- Layout glue: ONE fused slice/transpose to a lane-dense (K, M) tap matrix ---
    xc = x[:, :, : 4 * Ho, : 4 * Wo]                                # crop if not multiple of 4
    xr = xc.reshape(N, Cin, Ho, 4, Wo, 4)[:, :, :, 1:3, :, 1:3]     # (N,Cin,Ho,2,Wo,2)
    packed = xr.transpose(3, 5, 1, 0, 2, 4).reshape(K, M)           # k = (r*2+c)*Cin + ci

    # Fold the 0.25 average into the (tiny) weight: out = w_packed @ packed does avg+conv.
    w2 = weight.reshape(Cout, Cin).astype(x.dtype)
    w_packed = 0.25 * jnp.tile(w2, (1, 4))                          # (Cout, K), col k -> w2[:, k % Cin]

    # --- 1-D grid over M (lane axis) ---
    bm = min(block_m, M)                     # bm == M (full dim) or a multiple of 128
    n_blocks = pl.cdiv(M, bm)
    Mp = n_blocks * bm
    if Mp != M:
        packed = jnp.pad(packed, ((0, 0), (0, Mp - M)))

    out_flat = pl.pallas_call(
        _downsample4_kernel,
        out_shape=jax.ShapeDtypeStruct((Cout, Mp), x.dtype),
        grid=(n_blocks,),
        in_specs=[
            pl.BlockSpec((Cout, K), lambda i: (0, 0)),   # weight: constant block -> stays resident
            pl.BlockSpec((K, bm), lambda i: (0, i)),     # taps: streamed, double-buffered
        ],
        out_specs=pl.BlockSpec((Cout, bm), lambda i: (0, i)),
        compiler_params=pltpu.CompilerParams(
            dimension_semantics=("parallel",),           # megacore sharding on v7x; free elsewhere
        ),
    )(w_packed, packed)

    # Back to NCHW for module parity (output is 1/16 of the input -> cheap).
    # TODO(synk): if the consumer accepts channels-last, return (N, Ho, Wo, Cout) and skip this transpose.
    return out_flat[:, :M].reshape(Cout, N, Ho, Wo).transpose(1, 0, 2, 3)


def _reference(x, weight):
    """Pure-JAX reference for the same math (sanity check)."""
    N, Cin, H, W = x.shape
    Cout = weight.shape[0]
    Ho, Wo = H // 4, W // 4
    taps = [
        x[:, :, ri:ri + 4 * Ho:4, ci:ci + 4 * Wo:4]
        for (ri, ci) in ((1, 1), (1, 2), (2, 1), (2, 2))
    ]
    ds = 0.25 * (taps[0] + taps[1] + taps[2] + taps[3])             # (N, Cin, Ho, Wo)
    w2 = weight.reshape(Cout, Cin)
    return jnp.einsum("nchw,oc->nohw", ds, w2)


if __name__ == "__main__":
    key = jax.random.PRNGKey(0)
    k_x, k_w = jax.random.split(key)

    N, Cin, Cout, H, W = 2, 4, 8, 16, 16
    x = jax.random.normal(k_x, (N, Cin, H, W), dtype=jnp.float32)
    weight = jax.random.normal(k_w, (Cout, Cin, 1, 1), dtype=jnp.float32) * 0.1

    out = jax.block_until_ready(downsample_4(x, weight))
    ref = jax.block_until_ready(_reference(x, weight))

    assert out.shape == (N, Cout, H // 4, W // 4)
    assert jnp.allclose(out, ref, atol=1e-5, rtol=1e-5)

    print("KERNEL_OK")
</pallas_src>

<mosaic_0001>
module attributes {stable_mosaic.version = 11 : i64} {
  func.func @_downsample4_kernel(%arg0: i32, %arg1: memref<8x16xf32, #tpu.memory_space<vmem>>, %arg2: memref<16x32xf32, #tpu.memory_space<vmem>>, %arg3: memref<8x32xf32, #tpu.memory_space<vmem>>) attributes {dimension_semantics = [#tpu.dimension_semantics<parallel>], iteration_bounds = array<i64: 1>, scalar_prefetch = 0 : i64, scratch_operands = 0 : i64, tpu.core_type = #tpu.core_type<tc>, window_params = [{pipeline_mode = #tpu.pipeline_mode<synchronous>, transform_indices = @transform_0, window_bounds = array<i64: 8, 16>}, {transform_indices = @transform_1, window_bounds = array<i64: 16, 32>}, {transform_indices = @transform_2, window_bounds = array<i64: 8, 32>}]} {
    %c0 = arith.constant 0 : index
    %c0_0 = arith.constant 0 : index
    %0 = vector.load %arg1[%c0, %c0_0] : memref<8x16xf32, #tpu.memory_space<vmem>>, vector<8x16xf32>
    %c0_1 = arith.constant 0 : index
    %c0_2 = arith.constant 0 : index
    %1 = vector.load %arg2[%c0_1, %c0_2] : memref<16x32xf32, #tpu.memory_space<vmem>>, vector<16x32xf32>
    %cst = arith.constant dense<0.000000e+00> : vector<8x32xf32>
    %2 = tpu.matmul %0, %1, %cst {dimension_numbers = #tpu.dot_dimension_numbers<[1], [0], [0], [1], [0, 0, 1, 1], [], []>} : vector<8x16xf32>, vector<16x32xf32>, vector<8x32xf32> -> vector<8x32xf32>
    %c0_3 = arith.constant 0 : index
    %c0_4 = arith.constant 0 : index
    %3 = vector.load %arg3[%c0_3, %c0_4] : memref<8x32xf32, #tpu.memory_space<vmem>>, vector<8x32xf32>
    tpu.vector_store %arg3[%c0_3, %c0_4], %2 {strides = array<i32>} : memref<8x32xf32, #tpu.memory_space<vmem>>, vector<8x32xf32>,
    return
  }
  func.func @transform_0(%arg0: i32) -> (i32, i32) {
    %c0_i32 = arith.constant 0 : i32
    %c0_i32_0 = arith.constant 0 : i32
    %c0_i32_1 = arith.constant 0 : i32
    return %c0_i32, %c0_i32_0 : i32, i32
  }
  func.func @transform_1(%arg0: i32) -> (i32, i32) {
    %c0_i32 = arith.constant 0 : i32
    %c0_i32_0 = arith.constant 0 : i32
    return %c0_i32, %arg0 : i32, i32
  }
  func.func @transform_2(%arg0: i32) -> (i32, i32) {
    %c0_i32 = arith.constant 0 : i32
    %c0_i32_0 = arith.constant 0 : i32
    return %c0_i32, %arg0 : i32, i32
  }
}

</mosaic_0001>

<bundles_post_ra>
// kernel: tpu_custom_call.1
= control target key start
LH: loop header
LB: loop body
LE: loop exit
PB: predicated region body
PF: predicated region fallthrough
CT: control target
= control target key end

     0   :  { %7 = vsyncpa [#allocation3], 0  ;;  %s293_s0 = inlined_call_operand.hbm [shape: f32[8,16], index: 0, kind: input, shape index: {}]   ;;  %s294_s1 = inlined_call_operand.hbm [shape: f32[16,32], index: 1, kind: input, shape index: {}]   ;;  %s295_s2 = inlined_call_operand.hbm [shape: f32[8,32], index: 2, kind: output, shape index: {}]  }
   0x1   :  { %8 = vsyncpa [#allocation6], 0 }
   0x2   :  { %9 = vsyncpa [#allocation4], 0  ;;  %s227_s9 = smov [#allocation2]   ;;  %s228_s11 = smov [#allocation5]  }
   0x3   :  { %s16_s10 = sshll.u32 %s227_s9, 4  ;;  %s25_s12 = sshll.u32 %s228_s11, 4  ;;  %s17_s10 = int_to_ptr.vmem [resolvable:$true] %s16_s10  ;;  %s250_s12 = int_to_ptr.vmem [resolvable:$true] %s25_s12 }
   0x4   :  { %s155_s15 = scalar_lea.hbm %s293_s0, 128 }
   0x5   :  { %p156_p0 = scmp.ne.s32.totalorder %s293_s0, %s155_s15  ;;  %p159_p1 = scmp.lt.u32.totalorder %s155_s15, %s293_s0 }
   0x7   :  { %p161_p2 = pnand %p159_p1, %p156_p0 }
   0x9   :  { %164 = shalt.err (!%p161_p2)
}
   0xa   :  { %s165_s20 = scalar_lea.vmem %s17_s10, 128  ;;  %p170_p4 = scmp.lt.s32.totalorder %s17_s10, %s17_s10 }
   0xb   :  { %p166_p3 = scmp.ne.s32.totalorder %s17_s10, %s165_s20  ;;  %p171_p5 = scmp.lt.s32.totalorder %s165_s20, %s165_s20 }
   0xd   :  { %p172_p6 = por %p171_p5, %p170_p4 }
   0xf   :  { %p173_p7 = pnand %p172_p6, %p166_p3 }
  0x11   :  { %176 = shalt.err (!%p173_p7)
}
  0x12   :  { %19 = dma.hbm_to_vmem [thread:$0]  %s293_s0, 128, %s17_s10, [#allocation3]  }
  0x13   :  { %s177_s25 = scalar_lea.hbm %s294_s1, 256 }
  0x14   :  { %p178_p8 = scmp.ne.s32.totalorder %s294_s1, %s177_s25  ;;  %p181_p9 = scmp.lt.u32.totalorder %s177_s25, %s294_s1 }
  0x16   :  { %p183_p10 = pnand %p181_p9, %p178_p8 }
  0x18   :  { %186 = shalt.err (!%p183_p10)
}
  0x19   :  { %s187_s30 = scalar_lea.vmem %s250_s12, 256  ;;  %p192_p12 = scmp.lt.s32.totalorder %s250_s12, %s250_s12 }
  0x1a   :  { %p188_p11 = scmp.ne.s32.totalorder %s250_s12, %s187_s30  ;;  %p193_p13 = scmp.lt.s32.totalorder %s187_s30, %s187_s30 }
  0x1c   :  { %p194_p0 = por %p193_p13, %p192_p12 }
  0x1e   :  { %p195_p1 = pnand %p194_p0, %p188_p11 }
  0x20   :  { %198 = shalt.err (!%p195_p1)
}
  0x21   :  { %s229_s0 = smov 128   ;;  %s230_s3 = smov 8  }
  0x22   :  { %31 = dma.hbm_to_vmem [thread:$0]  %s294_s1, 256, %s250_s12, [#allocation6], %s229_s0, %s229_s0, %s230_s3  }
  0x23   :  { %221 = dma.done.wait [#allocation3], 128  }
  0x24   :  { %222 = vsyncadd [#allocation3], 4294967168 }
  0x25   :  { %223 = dma.done.wait [#allocation6], 256  }
  0x26   :  { %224 = vsyncadd [#allocation6], 4294967040  ;;  %v231_v0 = vmov 0.0|0.0   ;;  %vm232_vm0 = vmmov 0   ;;  %v233_v1 = vmov 0.0   ;;  %v39_v2 = vld [vmem:[#allocation5] sm:$0xff] }
  0x27   :  { %144 = vmatprep.subr.bf16.mxu0 %v231_v0  ;;  %141 = vmatprep.mubr.msk.f32.mxu0 %vm232_vm0, %v233_v1  ;;  %v40_v3 = vld [vmem:[#allocation5 + $0x8] sm:$0xff]  ;;  %v38_v5 = vld [vmem:[#allocation2] sm:$0xff]  ;;  %vm41_vm1 = vcmask 130048   ;;  %s234_s6 = smov [#allocation7]   ;;  %vm115_vm2 = vcmask 261120  }
  0x28   :  { %v145_v4 = vpack.c.bf16 %v40_v3, %v39_v2  ;;  %s123_s7 = sshll.u32 %s234_s6, 4  ;;  %s124_s7 = int_to_ptr.vmem [resolvable:$true] %s123_s7 }
  0x29   :  { %s199_s1 = scalar_lea.vmem %s124_s7, 128  ;;  %p204_p3 = scmp.lt.s32.totalorder %s124_s7, %s124_s7 }
  0x2a   :  { %146 = vmatpush3.bf16.msra.mxu0 %v145_v4  ;;  %p200_p2 = scmp.ne.s32.totalorder %s124_s7, %s199_s1  ;;  %p205_p4 = scmp.lt.s32.totalorder %s199_s1, %s199_s1 }
  0x2c   :  { %p206_p5 = por %p205_p4, %p204_p3 }
  0x2d   :  { %142 = vmatmul.mubr.msk.f32.vlgmr.msra.gmra.mrb[0].mxu0 %vm41_vm1, %v38_v5 }
  0x2e   :  { %p207_p6 = pnand %p206_p5, %p200_p2 }
 0x100   :  { %v111_v6 = vpop.f32.mrb[0].mxu0 }
 0x101   :  { %v143_v7 = vpop.f32.mrb[1].mxu0  ;;  %116 = vst.msk [vmem:[#allocation7] sm:$0xff] %vm115_vm2, %v111_v6 }
 0x102   :  { %210 = shalt.err (!%p207_p6)
}
 0x103   :  { %s211_s10 = scalar_lea.hbm %s295_s2, 128 }
 0x104   :  { %p212_p7 = scmp.ne.s32.totalorder %s295_s2, %s211_s10  ;;  %p215_p8 = scmp.lt.u32.totalorder %s211_s10, %s295_s2 }
 0x106   :  { %p217_p9 = pnand %p215_p8, %p212_p7 }
 0x108   :  { %220 = shalt.err (!%p217_p9)
}
 0x109   :  { %126 = dma.vmem_to_hbm [thread:$0]  %s124_s7, 128, %s295_s2, [#allocation4]  }
 0x10a   :  { %225 = dma.done.wait [#allocation4], 128  }
 0x10b   :  { %226 = vsyncadd [#allocation4], 4294967168 }
 0x10c   :  { %130 = vsyncpa [#allocation3], 1 }
 0x10d   :  { %131 = vsyncpa [#allocation6], 1 }
 0x10e   :  { %132 = vsyncpa [#allocation4], 1 }

</bundles_post_ra>
